<compile_context>
chip_gen: v5e
topology: v5e:2x2
jax: 0.10.0
libtpu: 0.0.40
codegen_flags: <defaults>
</compile_context>

<pallas_src>
import functools

import jax
import jax.numpy as jnp
from jax import lax
from jax.experimental import pallas as pl
from jax.experimental.pallas import tpu as pltpu

EPS = 1e-5  # nn.InstanceNorm2d default eps; affine=False, biased variance


# ---------------------------------------------------------------------------
# Shift helper: result[..., i] = t[..., (i + delta) % n] on the lane axis.
# The XLU rotate (pltpu.roll) is preferred; its rotate direction is probed
# once per backend, with an explicit slice+concat fallback.
# ---------------------------------------------------------------------------
_SHIFT_IMPL_CACHE = {}


def _probe_shift_impl():
    backend = jax.default_backend()
    impl = _SHIFT_IMPL_CACHE.get(backend)
    if impl is not None:
        return impl
    try:
        def probe_kernel(x_ref, o_ref):
            o_ref[...] = pltpu.roll(x_ref[...], 1, 1)

        x = jnp.tile(jnp.arange(256, dtype=jnp.float32)[None, :], (8, 1))
        y = pl.pallas_call(
            probe_kernel,
            out_shape=jax.ShapeDtypeStruct((8, 256), jnp.float32),
        )(x)
        v = float(jax.block_until_ready(y)[0, 0])
        if v == 255.0:
            impl = "roll_jnp"        # out[i] = x[i - shift]  (jnp.roll convention)
        elif v == 1.0:
            impl = "roll_flipped"    # out[i] = x[i + shift]
        else:
            impl = "concat"
    except Exception:
        impl = "concat"
    _SHIFT_IMPL_CACHE[backend] = impl
    return impl


def _make_shift_fn(impl):
    if impl == "concat":
        def shift(t, delta):
            n = t.shape[-1]
            d = delta % n
            if d == 0:
                return t
            return jnp.concatenate([t[..., d:], t[..., :d]], axis=-1)
    else:
        sign = -1 if impl == "roll_jnp" else 1

        def shift(t, delta):
            n = t.shape[-1]
            d = (sign * delta) % n
            if d == 0:
                return t
            return pltpu.roll(t, d, t.ndim - 1)
    return shift


# ---------------------------------------------------------------------------
# Kernel
# ---------------------------------------------------------------------------
def _make_kernel(B, C, Cp, H, W, HWp, conv_dtype, shift):
    HW = H * W
    pad_c = Cp - C
    pad_l = HWp - HW
    inv_hw = 1.0 / float(HW)

    def kernel(x_ref, w1_ref, w2_ref, o_ref):
        # Boundary masks: built once per grid step at full (Cp, L) shape so the
        # jnp.where calls below do no re-broadcasting. row = lane // W is
        # computed via f32 division (exact: the wrapper enforces H*W < 2**21)
        # to avoid relying on integer vector division.
        lane = lax.broadcasted_iota(jnp.int32, (Cp, HWp), 1)
        row = jnp.floor(
            (lane.astype(jnp.float32) + 0.5) / float(W)).astype(jnp.int32)
        col = lane - row * W
        top = row == 0
        bot = row == H - 1
        left = col == 0
        right = col == W - 1
        valid = (lane < HW).astype(jnp.float32) if pad_l else None

        def conv3x3(t, w_ref):
            # ReflectionPad2d(1) + 3x3 conv as 9 accumulating MXU dots over
            # shifted+masked taps (no im2col scratch). Conv bias omitted:
            # InstanceNorm2d(affine=False) cancels it exactly.
            up = shift(t, -W)                       # value of row h-1
            dn = shift(t, +W)                       # value of row h+1
            rows = (
                jnp.where(top, dn, up),             # dy = -1 (reflect at top)
                t,                                  # dy =  0
                jnp.where(bot, up, dn),             # dy = +1 (reflect at bottom)
            )
            acc = None
            for dy, g in enumerate(rows):
                lf = shift(g, -1)                   # value of col w-1
                rt = shift(g, +1)                   # value of col w+1
                taps = (
                    jnp.where(left, rt, lf),        # dx = -1 (reflect at left)
                    g,                              # dx =  0
                    jnp.where(right, lf, rt),       # dx = +1 (reflect at right)
                )
                for dx, tap in enumerate(taps):
                    k = 3 * dy + dx
                    # TODO(synk): on v6e/v7x with Cp <= 128, pairing taps on the
                    # K axis (K = 2*Cp) would fill more of the 256-deep MXU.
                    d = jnp.dot(w_ref[k], tap.astype(conv_dtype),
                                preferred_element_type=jnp.float32)
                    acc = d if acc is None else acc + d
            return acc

        def instance_norm(y):
            if valid is None:
                mean = jnp.mean(y, axis=1, keepdims=True)
                cen = y - mean
                var = jnp.mean(cen * cen, axis=1, keepdims=True)
            else:
                mean = jnp.sum(y * valid, axis=1, keepdims=True) * inv_hw
                cen = y - mean
                cv = cen * valid
                var = jnp.sum(cv * cv, axis=1, keepdims=True) * inv_hw
            out = cen * lax.rsqrt(var + EPS)
            if valid is not None:
                out = out * valid                   # keep padded lanes at zero
            return out

        for b in range(B):                          # static unroll over images
            x = x_ref[b].astype(jnp.float32)        # (C, L), lane-dense
            if pad_c:
                xp = jnp.concatenate(
                    [x, jnp.zeros((pad_c, HWp), jnp.float32)], axis=0)
            else:
                xp = x
            y = instance_norm(conv3x3(xp, w1_ref))
            y = jnp.maximum(y, 0.0)                 # ReLU
            y = instance_norm(conv3x3(y, w2_ref))
            o_ref[b] = (x + y[:C]).astype(o_ref.dtype)   # residual add

    return kernel


# ---------------------------------------------------------------------------
# Wrapper
# ---------------------------------------------------------------------------
def _pick_images_per_step(N, C, HWp, itemsize):
    """Largest divisor of N that still leaves >= 2 grid steps (v7x has two
    TensorCores) and keeps the double-buffered in/out blocks small."""
    budget = 8 * 1024 * 1024
    min_steps = 2 if N >= 2 else 1
    best = 1
    for b in range(1, N + 1):
        if N % b:
            continue
        if N // b < min_steps:
            continue
        if 4 * b * C * HWp * itemsize > budget:
            continue
        best = b
    return best


@functools.partial(jax.jit, static_argnames=("conv_dtype", "shift_impl"))
def _residual_block(x, w1, w2, *, conv_dtype, shift_impl):
    N, C, H, W = x.shape
    if H < 2 or W < 2:
        raise ValueError("ReflectionPad2d(1) requires H >= 2 and W >= 2")
    if H * W >= (1 << 21):
        # TODO(synk): for very large images switch the in-kernel row/col
        # computation to precomputed index inputs.
        raise ValueError("spatial size too large for in-kernel index math")
    HW = H * W
    HWp = ((HW + 127) // 128) * 128     # lane-dense spatial axis
    Cp = ((C + 7) // 8) * 8             # channels padded to sublane tile
                                        # (activations padded in-kernel only)

    x_flat = x.reshape(N, C, HW)        # free reshape, no HBM pass
    if HWp != HW:
        x_flat = jnp.pad(x_flat, ((0, 0), (0, 0), (0, HWp - HW)))

    def prep_w(w):
        # (Cout, Cin, 3, 3) -> (9, Cout, Cin) with k = ky*3 + kx, then pad
        # both channel axes to Cp (zero rows/cols are mathematically inert).
        w9 = jnp.transpose(w, (2, 3, 0, 1)).reshape(9, C, C)
        if Cp != C:
            w9 = jnp.pad(w9, ((0, 0), (0, Cp - C), (0, Cp - C)))
        return w9.astype(conv_dtype)

    w1r, w2r = prep_w(w1), prep_w(w2)

    B = _pick_images_per_step(N, C, HWp, x.dtype.itemsize)
    G = N // B

    kernel = _make_kernel(B, C, Cp, H, W, HWp, conv_dtype,
                          _make_shift_fn(shift_impl))

    # VMEM limit from the actual footprint, capped v7x-safe (<= 48 MiB).
    io_bytes = B * C * HWp * x.dtype.itemsize
    w_bytes = 2 * 9 * Cp * Cp * jnp.dtype(conv_dtype).itemsize
    tmp_bytes = 16 * Cp * HWp * 4
    vmem_limit = int(min(48 * 2 ** 20,
                         max(32 * 2 ** 20,
                             4 * io_bytes + w_bytes + 2 * tmp_bytes)))

    out_flat = pl.pallas_call(
        kernel,
        out_shape=jax.ShapeDtypeStruct((N, C, HWp), x.dtype),
        grid=(G,),
        in_specs=[
            pl.BlockSpec((B, C, HWp), lambda g: (g, 0, 0)),       # images
            pl.BlockSpec(memory_space=pltpu.MemorySpace.VMEM),    # conv1 weight
            pl.BlockSpec(memory_space=pltpu.MemorySpace.VMEM),    # conv2 weight
        ],
        out_specs=pl.BlockSpec((B, C, HWp), lambda g: (g, 0, 0)),
        compiler_params=pltpu.CompilerParams(
            dimension_semantics=("parallel",),
            vmem_limit_bytes=vmem_limit,
        ),
    )(x_flat, w1r, w2r)

    if HWp != HW:
        out_flat = out_flat[..., :HW]
    return out_flat.reshape(N, C, H, W)


def residual_block(x, w1, b1, w2, b2, conv_dtype=jnp.bfloat16):
    """Forward pass of ResidualBlock.

    b1/b2 are accepted for parameter parity with nn.Conv2d(bias=True) but are
    unused: InstanceNorm2d(affine=False) subtracts the per-channel spatial
    mean right after each conv, so the bias cancels exactly.
    conv_dtype=bfloat16 (default) feeds the MXU its native operand dtype on
    v6e/v7x (f32 accumulation); pass jnp.float32 for ~1e-4 parity with an f32
    reference.
    """
    del b1, b2
    return _residual_block(x, w1, w2, conv_dtype=conv_dtype,
                           shift_impl=_probe_shift_impl())


# ---------------------------------------------------------------------------
# Pure-JAX reference (includes the bias, demonstrating it is a no-op).
# ---------------------------------------------------------------------------
def _reference(x, w1, b1, w2, b2):
    def conv(t, w, b):
        p = jnp.pad(t, ((0, 0), (0, 0), (1, 1), (1, 1)), mode="reflect")
        y = lax.conv_general_dilated(
            p, w, window_strides=(1, 1), padding="VALID",
            dimension_numbers=("NCHW", "OIHW", "NCHW"))
        return y + b[None, :, None, None]

    def inorm(t):
        m = jnp.mean(t, axis=(2, 3), keepdims=True)
        v = jnp.mean((t - m) ** 2, axis=(2, 3), keepdims=True)
        return (t - m) / jnp.sqrt(v + EPS)

    y = jnp.maximum(inorm(conv(x, w1, b1)), 0.0)
    y = inorm(conv(y, w2, b2))
    return x + y


if __name__ == "__main__":
    N, C, H, W = 2, 4, 16, 16
    key = jax.random.PRNGKey(0)
    kx, k1, k2, k3, k4 = jax.random.split(key, 5)

    x = jax.random.normal(kx, (N, C, H, W), dtype=jnp.float32)
    fan_in = C * 3 * 3
    bound = 1.0 / float(fan_in) ** 0.5
    w1 = jax.random.uniform(k1, (C, C, 3, 3), jnp.float32, -bound, bound)
    b1 = jax.random.uniform(k2, (C,), jnp.float32, -bound, bound)
    w2 = jax.random.uniform(k3, (C, C, 3, 3), jnp.float32, -bound, bound)
    b2 = jax.random.uniform(k4, (C,), jnp.float32, -bound, bound)

    ref = _reference(x, w1, b1, w2, b2)

    # f32 MXU operands: tight parity with the f32 PyTorch-equivalent reference.
    out_f32 = jax.block_until_ready(
        residual_block(x, w1, b1, w2, b2, conv_dtype=jnp.float32))
    assert out_f32.shape == (N, C, H, W)
    err_f32 = float(jnp.max(jnp.abs(out_f32 - ref)))
    assert jnp.allclose(out_f32, ref, atol=1e-4, rtol=1e-4), err_f32

    # Default bf16 MXU operands (v6e/v7x-native): looser tolerance.
    out_bf16 = jax.block_until_ready(residual_block(x, w1, b1, w2, b2))
    err_bf16 = float(jnp.max(jnp.abs(out_bf16 - ref)))
    assert jnp.allclose(out_bf16, ref, atol=2.5e-1, rtol=0.0), err_bf16

    print("KERNEL_OK")
</pallas_src>

<mosaic_0001>
module attributes {stable_mosaic.version = 11 : i64} {
  func.func @probe_kernel(%arg0: memref<8x256xf32, #tpu.memory_space<vmem>>, %arg1: memref<8x256xf32, #tpu.memory_space<vmem>>) attributes {dimension_semantics = [], scalar_prefetch = 0 : i64, scratch_operands = 0 : i64, tpu.core_type = #tpu.core_type<tc>} {
    %c0 = arith.constant 0 : index
    %c0_0 = arith.constant 0 : index
    %0 = vector.load %arg0[%c0, %c0_0] : memref<8x256xf32, #tpu.memory_space<vmem>>, vector<8x256xf32>
    %c1_i32 = arith.constant 1 : i32
    %1 = tpu.dynamic_rotate %0 by %c1_i32 dim 1 : vector<8x256xf32>, i32 -> vector<8x256xf32>
    %c0_1 = arith.constant 0 : index
    %c0_2 = arith.constant 0 : index
    %2 = vector.load %arg1[%c0_1, %c0_2] : memref<8x256xf32, #tpu.memory_space<vmem>>, vector<8x256xf32>
    tpu.vector_store %arg1[%c0_1, %c0_2], %1 {strides = array<i32>} : memref<8x256xf32, #tpu.memory_space<vmem>>, vector<8x256xf32>,
    return
  }
}

module attributes {stable_mosaic.version = 11 : i64} {
  func.func @kernel(%arg0: i32, %arg1: memref<1x4x256xf32, #tpu.memory_space<vmem>>, %arg2: memref<9x8x8xf32, #tpu.memory_space<vmem>>, %arg3: memref<9x8x8xf32, #tpu.memory_space<vmem>>, %arg4: memref<1x4x256xf32, #tpu.memory_space<vmem>>) attributes {dimension_semantics = [#tpu.dimension_semantics<parallel>], iteration_bounds = array<i64: 2>, scalar_prefetch = 0 : i64, scratch_operands = 0 : i64, tpu.core_type = #tpu.core_type<tc>, window_params = [{transform_indices = @transform_0, window_bounds = array<i64: 1, 4, 256>}, {pipeline_mode = #tpu.pipeline_mode<synchronous>, transform_indices = @transform_1, window_bounds = array<i64: 9, 8, 8>}, {pipeline_mode = #tpu.pipeline_mode<synchronous>, transform_indices = @transform_2, window_bounds = array<i64: 9, 8, 8>}, {transform_indices = @transform_3, window_bounds = array<i64: 1, 4, 256>}]} {
    %0 = tpu.iota {dimensions = array<i32: 1>} : vector<8x256xi32>
    %1 = arith.sitofp %0 : vector<8x256xi32> to vector<8x256xf32>
    %cst = arith.constant 5.000000e-01 : f32
    %2 = vector.broadcast %cst : f32 to vector<8x256xf32>
    %3 = arith.addf %1, %2 : vector<8x256xf32>
    %cst_0 = arith.constant 1.600000e+01 : f32
    %4 = vector.broadcast %cst_0 : f32 to vector<8x256xf32>
    %5 = arith.divf %3, %4 : vector<8x256xf32>
    %6 = math.floor %5 : vector<8x256xf32>
    %7 = arith.fptosi %6 : vector<8x256xf32> to vector<8x256xi32>
    %c16_i32 = arith.constant 16 : i32
    %8 = vector.broadcast %c16_i32 : i32 to vector<8x256xi32>
    %9 = arith.muli %7, %8 : vector<8x256xi32>
    %10 = arith.subi %0, %9 : vector<8x256xi32>
    %c0_i32 = arith.constant 0 : i32
    %11 = vector.broadcast %c0_i32 : i32 to vector<8x256xi32>
    %12 = arith.cmpi eq, %7, %11 : vector<8x256xi32>
    %c15_i32 = arith.constant 15 : i32
    %13 = vector.broadcast %c15_i32 : i32 to vector<8x256xi32>
    %14 = arith.cmpi eq, %7, %13 : vector<8x256xi32>
    %c0_i32_1 = arith.constant 0 : i32
    %15 = vector.broadcast %c0_i32_1 : i32 to vector<8x256xi32>
    %16 = arith.cmpi eq, %10, %15 : vector<8x256xi32>
    %c15_i32_2 = arith.constant 15 : i32
    %17 = vector.broadcast %c15_i32_2 : i32 to vector<8x256xi32>
    %18 = arith.cmpi eq, %10, %17 : vector<8x256xi32>
    %c0 = arith.constant 0 : index
    %c0_3 = arith.constant 0 : index
    %c0_4 = arith.constant 0 : index
    %19 = vector.load %arg1[%c0, %c0_3, %c0_4] : memref<1x4x256xf32, #tpu.memory_space<vmem>>, vector<1x4x256xf32>
    %20 = vector.shape_cast %19 : vector<1x4x256xf32> to vector<4x256xf32>
    %cst_5 = arith.constant 0.000000e+00 : f32
    %21 = vector.broadcast %cst_5 : f32 to vector<4x256xf32>
    %22 = tpu.concatenate %20, %21 in 0 : vector<4x256xf32>, vector<4x256xf32> -> vector<8x256xf32>
    %23 = vector.extract_strided_slice %22 {offsets = [0, 240], sizes = [8, 16], strides = [1, 1]} : vector<8x256xf32> to vector<8x16xf32>
    %24 = vector.extract_strided_slice %22 {offsets = [0, 0], sizes = [8, 240], strides = [1, 1]} : vector<8x256xf32> to vector<8x240xf32>
    %25 = tpu.concatenate %23, %24 in 1 : vector<8x16xf32>, vector<8x240xf32> -> vector<8x256xf32>
    %26 = vector.extract_strided_slice %22 {offsets = [0, 16], sizes = [8, 240], strides = [1, 1]} : vector<8x256xf32> to vector<8x240xf32>
    %27 = vector.extract_strided_slice %22 {offsets = [0, 0], sizes = [8, 16], strides = [1, 1]} : vector<8x256xf32> to vector<8x16xf32>
    %28 = tpu.concatenate %26, %27 in 1 : vector<8x240xf32>, vector<8x16xf32> -> vector<8x256xf32>
    %29 = arith.select %12, %28, %25 : vector<8x256xi1>, vector<8x256xf32>
    %30 = arith.select %14, %25, %28 : vector<8x256xi1>, vector<8x256xf32>
    %31 = vector.extract_strided_slice %29 {offsets = [0, 255], sizes = [8, 1], strides = [1, 1]} : vector<8x256xf32> to vector<8x1xf32>
    %32 = vector.extract_strided_slice %29 {offsets = [0, 0], sizes = [8, 255], strides = [1, 1]} : vector<8x256xf32> to vector<8x255xf32>
    %33 = tpu.concatenate %31, %32 in 1 : vector<8x1xf32>, vector<8x255xf32> -> vector<8x256xf32>
    %34 = vector.extract_strided_slice %29 {offsets = [0, 1], sizes = [8, 255], strides = [1, 1]} : vector<8x256xf32> to vector<8x255xf32>
    %35 = vector.extract_strided_slice %29 {offsets = [0, 0], sizes = [8, 1], strides = [1, 1]} : vector<8x256xf32> to vector<8x1xf32>
    %36 = tpu.concatenate %34, %35 in 1 : vector<8x255xf32>, vector<8x1xf32> -> vector<8x256xf32>
    %37 = arith.select %16, %36, %33 : vector<8x256xi1>, vector<8x256xf32>
    %38 = arith.select %18, %33, %36 : vector<8x256xi1>, vector<8x256xf32>
    %c0_6 = arith.constant 0 : index
    %c0_7 = arith.constant 0 : index
    %c0_8 = arith.constant 0 : index
    %39 = vector.load %arg2[%c0_6, %c0_7, %c0_8] : memref<9x8x8xf32, #tpu.memory_space<vmem>>, vector<1x8x8xf32>
    %40 = vector.shape_cast %39 : vector<1x8x8xf32> to vector<8x8xf32>
    %cst_9 = arith.constant dense<0.000000e+00> : vector<8x256xf32>
    %41 = tpu.matmul %40, %37, %cst_9 {dimension_numbers = #tpu.dot_dimension_numbers<[1], [0], [0], [1], [0, 0, 1, 1], [], []>} : vector<8x8xf32>, vector<8x256xf32>, vector<8x256xf32> -> vector<8x256xf32>
    %c1 = arith.constant 1 : index
    %c0_10 = arith.constant 0 : index
    %c0_11 = arith.constant 0 : index
    %42 = vector.load %arg2[%c1, %c0_10, %c0_11] : memref<9x8x8xf32, #tpu.memory_space<vmem>>, vector<1x8x8xf32>
    %43 = vector.shape_cast %42 : vector<1x8x8xf32> to vector<8x8xf32>
    %cst_12 = arith.constant dense<0.000000e+00> : vector<8x256xf32>
    %44 = tpu.matmul %43, %29, %cst_12 {dimension_numbers = #tpu.dot_dimension_numbers<[1], [0], [0], [1], [0, 0, 1, 1], [], []>} : vector<8x8xf32>, vector<8x256xf32>, vector<8x256xf32> -> vector<8x256xf32>
    %45 = arith.addf %41, %44 : vector<8x256xf32>
    %c2 = arith.constant 2 : index
    %c0_13 = arith.constant 0 : index
    %c0_14 = arith.constant 0 : index
    %46 = vector.load %arg2[%c2, %c0_13, %c0_14] : memref<9x8x8xf32, #tpu.memory_space<vmem>>, vector<1x8x8xf32>
    %47 = vector.shape_cast %46 : vector<1x8x8xf32> to vector<8x8xf32>
    %cst_15 = arith.constant dense<0.000000e+00> : vector<8x256xf32>
    %48 = tpu.matmul %47, %38, %cst_15 {dimension_numbers = #tpu.dot_dimension_numbers<[1], [0], [0], [1], [0, 0, 1, 1], [], []>} : vector<8x8xf32>, vector<8x256xf32>, vector<8x256xf32> -> vector<8x256xf32>
    %49 = arith.addf %45, %48 : vector<8x256xf32>
    %50 = vector.extract_strided_slice %22 {offsets = [0, 255], sizes = [8, 1], strides = [1, 1]} : vector<8x256xf32> to vector<8x1xf32>
    %51 = vector.extract_strided_slice %22 {offsets = [0, 0], sizes = [8, 255], strides = [1, 1]} : vector<8x256xf32> to vector<8x255xf32>
    %52 = tpu.concatenate %50, %51 in 1 : vector<8x1xf32>, vector<8x255xf32> -> vector<8x256xf32>
    %53 = vector.extract_strided_slice %22 {offsets = [0, 1], sizes = [8, 255], strides = [1, 1]} : vector<8x256xf32> to vector<8x255xf32>
    %54 = vector.extract_strided_slice %22 {offsets = [0, 0], sizes = [8, 1], strides = [1, 1]} : vector<8x256xf32> to vector<8x1xf32>
    %55 = tpu.concatenate %53, %54 in 1 : vector<8x255xf32>, vector<8x1xf32> -> vector<8x256xf32>
    %56 = arith.select %16, %55, %52 : vector<8x256xi1>, vector<8x256xf32>
    %57 = arith.select %18, %52, %55 : vector<8x256xi1>, vector<8x256xf32>
    %c3 = arith.constant 3 : index
    %c0_16 = arith.constant 0 : index
    %c0_17 = arith.constant 0 : index
    %58 = vector.load %arg2[%c3, %c0_16, %c0_17] : memref<9x8x8xf32, #tpu.memory_space<vmem>>, vector<1x8x8xf32>
    %59 = vector.shape_cast %58 : vector<1x8x8xf32> to vector<8x8xf32>
    %cst_18 = arith.constant dense<0.000000e+00> : vector<8x256xf32>
    %60 = tpu.matmul %59, %56, %cst_18 {dimension_numbers = #tpu.dot_dimension_numbers<[1], [0], [0], [1], [0, 0, 1, 1], [], []>} : vector<8x8xf32>, vector<8x256xf32>, vector<8x256xf32> -> vector<8x256xf32>
    %61 = arith.addf %49, %60 : vector<8x256xf32>
    %c4 = arith.constant 4 : index
    %c0_19 = arith.constant 0 : index
    %c0_20 = arith.constant 0 : index
    %62 = vector.load %arg2[%c4, %c0_19, %c0_20] : memref<9x8x8xf32, #tpu.memory_space<vmem>>, vector<1x8x8xf32>
    %63 = vector.shape_cast %62 : vector<1x8x8xf32> to vector<8x8xf32>
    %cst_21 = arith.constant dense<0.000000e+00> : vector<8x256xf32>
    %64 = tpu.matmul %63, %22, %cst_21 {dimension_numbers = #tpu.dot_dimension_numbers<[1], [0], [0], [1], [0, 0, 1, 1], [], []>} : vector<8x8xf32>, vector<8x256xf32>, vector<8x256xf32> -> vector<8x256xf32>
    %65 = arith.addf %61, %64 : vector<8x256xf32>
    %c5 = arith.constant 5 : index
    %c0_22 = arith.constant 0 : index
    %c0_23 = arith.constant 0 : index
    %66 = vector.load %arg2[%c5, %c0_22, %c0_23] : memref<9x8x8xf32, #tpu.memory_space<vmem>>, vector<1x8x8xf32>
    %67 = vector.shape_cast %66 : vector<1x8x8xf32> to vector<8x8xf32>
    %cst_24 = arith.constant dense<0.000000e+00> : vector<8x256xf32>
    %68 = tpu.matmul %67, %57, %cst_24 {dimension_numbers = #tpu.dot_dimension_numbers<[1], [0], [0], [1], [0, 0, 1, 1], [], []>} : vector<8x8xf32>, vector<8x256xf32>, vector<8x256xf32> -> vector<8x256xf32>
    %69 = arith.addf %65, %68 : vector<8x256xf32>
    %70 = vector.extract_strided_slice %30 {offsets = [0, 255], sizes = [8, 1], strides = [1, 1]} : vector<8x256xf32> to vector<8x1xf32>
    %71 = vector.extract_strided_slice %30 {offsets = [0, 0], sizes = [8, 255], strides = [1, 1]} : vector<8x256xf32> to vector<8x255xf32>
    %72 = tpu.concatenate %70, %71 in 1 : vector<8x1xf32>, vector<8x255xf32> -> vector<8x256xf32>
    %73 = vector.extract_strided_slice %30 {offsets = [0, 1], sizes = [8, 255], strides = [1, 1]} : vector<8x256xf32> to vector<8x255xf32>
    %74 = vector.extract_strided_slice %30 {offsets = [0, 0], sizes = [8, 1], strides = [1, 1]} : vector<8x256xf32> to vector<8x1xf32>
    %75 = tpu.concatenate %73, %74 in 1 : vector<8x255xf32>, vector<8x1xf32> -> vector<8x256xf32>
    %76 = arith.select %16, %75, %72 : vector<8x256xi1>, vector<8x256xf32>
    %77 = arith.select %18, %72, %75 : vector<8x256xi1>, vector<8x256xf32>
    %c6 = arith.constant 6 : index
    %c0_25 = arith.constant 0 : index
    %c0_26 = arith.constant 0 : index
    %78 = vector.load %arg2[%c6, %c0_25, %c0_26] : memref<9x8x8xf32, #tpu.memory_space<vmem>>, vector<1x8x8xf32>
    %79 = vector.shape_cast %78 : vector<1x8x8xf32> to vector<8x8xf32>
    %cst_27 = arith.constant dense<0.000000e+00> : vector<8x256xf32>
    %80 = tpu.matmul %79, %76, %cst_27 {dimension_numbers = #tpu.dot_dimension_numbers<[1], [0], [0], [1], [0, 0, 1, 1], [], []>} : vector<8x8xf32>, vector<8x256xf32>, vector<8x256xf32> -> vector<8x256xf32>
    %81 = arith.addf %69, %80 : vector<8x256xf32>
    %c7 = arith.constant 7 : index
    %c0_28 = arith.constant 0 : index
    %c0_29 = arith.constant 0 : index
    %82 = vector.load %arg2[%c7, %c0_28, %c0_29] : memref<9x8x8xf32, #tpu.memory_space<vmem>>, vector<1x8x8xf32>
    %83 = vector.shape_cast %82 : vector<1x8x8xf32> to vector<8x8xf32>
    %cst_30 = arith.constant dense<0.000000e+00> : vector<8x256xf32>
    %84 = tpu.matmul %83, %30, %cst_30 {dimension_numbers = #tpu.dot_dimension_numbers<[1], [0], [0], [1], [0, 0, 1, 1], [], []>} : vector<8x8xf32>, vector<8x256xf32>, vector<8x256xf32> -> vector<8x256xf32>
    %85 = arith.addf %81, %84 : vector<8x256xf32>
    %c8 = arith.constant 8 : index
    %c0_31 = arith.constant 0 : index
    %c0_32 = arith.constant 0 : index
    %86 = vector.load %arg2[%c8, %c0_31, %c0_32] : memref<9x8x8xf32, #tpu.memory_space<vmem>>, vector<1x8x8xf32>
    %87 = vector.shape_cast %86 : vector<1x8x8xf32> to vector<8x8xf32>
    %cst_33 = arith.constant dense<0.000000e+00> : vector<8x256xf32>
    %88 = tpu.matmul %87, %77, %cst_33 {dimension_numbers = #tpu.dot_dimension_numbers<[1], [0], [0], [1], [0, 0, 1, 1], [], []>} : vector<8x8xf32>, vector<8x256xf32>, vector<8x256xf32> -> vector<8x256xf32>
    %89 = arith.addf %85, %88 : vector<8x256xf32>
    %cst_34 = arith.constant dense<0.000000e+00> : vector<8xf32>
    %90 = vector.multi_reduction <add>, %89, %cst_34 [1] : vector<8x256xf32> to vector<8xf32>
    %91 = vector.shape_cast %90 : vector<8xf32> to vector<8x1xf32>
    %cst_35 = arith.constant 2.560000e+02 : f32
    %92 = vector.broadcast %cst_35 : f32 to vector<8x1xf32>
    %93 = arith.divf %91, %92 : vector<8x1xf32>
    %94 = vector.broadcast %93 : vector<8x1xf32> to vector<8x256xf32>
    %95 = arith.subf %89, %94 : vector<8x256xf32>
    %96 = arith.mulf %95, %95 : vector<8x256xf32>
    %cst_36 = arith.constant dense<0.000000e+00> : vector<8xf32>
    %97 = vector.multi_reduction <add>, %96, %cst_36 [1] : vector<8x256xf32> to vector<8xf32>
    %98 = vector.shape_cast %97 : vector<8xf32> to vector<8x1xf32>
    %cst_37 = arith.constant 2.560000e+02 : f32
    %99 = vector.broadcast %cst_37 : f32 to vector<8x1xf32>
    %100 = arith.divf %98, %99 : vector<8x1xf32>
    %cst_38 = arith.constant 9.99999974E-6 : f32
    %101 = vector.broadcast %cst_38 : f32 to vector<8x1xf32>
    %102 = arith.addf %100, %101 : vector<8x1xf32>
    %103 = math.rsqrt %102 : vector<8x1xf32>
    %104 = vector.broadcast %103 : vector<8x1xf32> to vector<8x256xf32>
    %105 = arith.mulf %95, %104 : vector<8x256xf32>
    %cst_39 = arith.constant 0.000000e+00 : f32
    %106 = vector.broadcast %cst_39 : f32 to vector<8x256xf32>
    %107 = arith.maximumf %105, %106 : vector<8x256xf32>
    %108 = vector.extract_strided_slice %107 {offsets = [0, 240], sizes = [8, 16], strides = [1, 1]} : vector<8x256xf32> to vector<8x16xf32>
    %109 = vector.extract_strided_slice %107 {offsets = [0, 0], sizes = [8, 240], strides = [1, 1]} : vector<8x256xf32> to vector<8x240xf32>
    %110 = tpu.concatenate %108, %109 in 1 : vector<8x16xf32>, vector<8x240xf32> -> vector<8x256xf32>
    %111 = vector.extract_strided_slice %107 {offsets = [0, 16], sizes = [8, 240], strides = [1, 1]} : vector<8x256xf32> to vector<8x240xf32>
    %112 = vector.extract_strided_slice %107 {offsets = [0, 0], sizes = [8, 16], strides = [1, 1]} : vector<8x256xf32> to vector<8x16xf32>
    %113 = tpu.concatenate %111, %112 in 1 : vector<8x240xf32>, vector<8x16xf32> -> vector<8x256xf32>
    %114 = arith.select %12, %113, %110 : vector<8x256xi1>, vector<8x256xf32>
    %115 = arith.select %14, %110, %113 : vector<8x256xi1>, vector<8x256xf32>
    %116 = vector.extract_strided_slice %114 {offsets = [0, 255], sizes = [8, 1], strides = [1, 1]} : vector<8x256xf32> to vector<8x1xf32>
    %117 = vector.extract_strided_slice %114 {offsets = [0, 0], sizes = [8, 255], strides = [1, 1]} : vector<8x256xf32> to vector<8x255xf32>
    %118 = tpu.concatenate %116, %117 in 1 : vector<8x1xf32>, vector<8x255xf32> -> vector<8x256xf32>
    %119 = vector.extract_strided_slice %114 {offsets = [0, 1], sizes = [8, 255], strides = [1, 1]} : vector<8x256xf32> to vector<8x255xf32>
    %120 = vector.extract_strided_slice %114 {offsets = [0, 0], sizes = [8, 1], strides = [1, 1]} : vector<8x256xf32> to vector<8x1xf32>
    %121 = tpu.concatenate %119, %120 in 1 : vector<8x255xf32>, vector<8x1xf32> -> vector<8x256xf32>
    %122 = arith.select %16, %121, %118 : vector<8x256xi1>, vector<8x256xf32>
    %123 = arith.select %18, %118, %121 : vector<8x256xi1>, vector<8x256xf32>
    %c0_40 = arith.constant 0 : index
    %c0_41 = arith.constant 0 : index
    %c0_42 = arith.constant 0 : index
    %124 = vector.load %arg3[%c0_40, %c0_41, %c0_42] : memref<9x8x8xf32, #tpu.memory_space<vmem>>, vector<1x8x8xf32>
    %125 = vector.shape_cast %124 : vector<1x8x8xf32> to vector<8x8xf32>
    %cst_43 = arith.constant dense<0.000000e+00> : vector<8x256xf32>
    %126 = tpu.matmul %125, %122, %cst_43 {dimension_numbers = #tpu.dot_dimension_numbers<[1], [0], [0], [1], [0, 0, 1, 1], [], []>} : vector<8x8xf32>, vector<8x256xf32>, vector<8x256xf32> -> vector<8x256xf32>
    %c1_44 = arith.constant 1 : index
    %c0_45 = arith.constant 0 : index
    %c0_46 = arith.constant 0 : index
    %127 = vector.load %arg3[%c1_44, %c0_45, %c0_46] : memref<9x8x8xf32, #tpu.memory_space<vmem>>, vector<1x8x8xf32>
    %128 = vector.shape_cast %127 : vector<1x8x8xf32> to vector<8x8xf32>
    %cst_47 = arith.constant dense<0.000000e+00> : vector<8x256xf32>
    %129 = tpu.matmul %128, %114, %cst_47 {dimension_numbers = #tpu.dot_dimension_numbers<[1], [0], [0], [1], [0, 0, 1, 1], [], []>} : vector<8x8xf32>, vector<8x256xf32>, vector<8x256xf32> -> vector<8x256xf32>
    %130 = arith.addf %126, %129 : vector<8x256xf32>
    %c2_48 = arith.constant 2 : index
    %c0_49 = arith.constant 0 : index
    %c0_50 = arith.constant 0 : index
    %131 = vector.load %arg3[%c2_48, %c0_49, %c0_50] : memref<9x8x8xf32, #tpu.memory_space<vmem>>, vector<1x8x8xf32>
    %132 = vector.shape_cast %131 : vector<1x8x8xf32> to vector<8x8xf32>
    %cst_51 = arith.constant dense<0.000000e+00> : vector<8x256xf32>
    %133 = tpu.matmul %132, %123, %cst_51 {dimension_numbers = #tpu.dot_dimension_numbers<[1], [0], [0], [1], [0, 0, 1, 1], [], []>} : vector<8x8xf32>, vector<8x256xf32>, vector<8x256xf32> -> vector<8x256xf32>
    %134 = arith.addf %130, %133 : vector<8x256xf32>
    %135 = vector.extract_strided_slice %107 {offsets = [0, 255], sizes = [8, 1], strides = [1, 1]} : vector<8x256xf32> to vector<8x1xf32>
    %136 = vector.extract_strided_slice %107 {offsets = [0, 0], sizes = [8, 255], strides = [1, 1]} : vector<8x256xf32> to vector<8x255xf32>
    %137 = tpu.concatenate %135, %136 in 1 : vector<8x1xf32>, vector<8x255xf32> -> vector<8x256xf32>
    %138 = vector.extract_strided_slice %107 {offsets = [0, 1], sizes = [8, 255], strides = [1, 1]} : vector<8x256xf32> to vector<8x255xf32>
    %139 = vector.extract_strided_slice %107 {offsets = [0, 0], sizes = [8, 1], strides = [1, 1]} : vector<8x256xf32> to vector<8x1xf32>
    %140 = tpu.concatenate %138, %139 in 1 : vector<8x255xf32>, vector<8x1xf32> -> vector<8x256xf32>
    %141 = arith.select %16, %140, %137 : vector<8x256xi1>, vector<8x256xf32>
    %142 = arith.select %18, %137, %140 : vector<8x256xi1>, vector<8x256xf32>
    %c3_52 = arith.constant 3 : index
    %c0_53 = arith.constant 0 : index
    %c0_54 = arith.constant 0 : index
    %143 = vector.load %arg3[%c3_52, %c0_53, %c0_54] : memref<9x8x8xf32, #tpu.memory_space<vmem>>, vector<1x8x8xf32>
    %144 = vector.shape_cast %143 : vector<1x8x8xf32> to vector<8x8xf32>
    %cst_55 = arith.constant dense<0.000000e+00> : vector<8x256xf32>
    %145 = tpu.matmul %144, %141, %cst_55 {dimension_numbers = #tpu.dot_dimension_numbers<[1], [0], [0], [1], [0, 0, 1, 1], [], []>} : vector<8x8xf32>, vector<8x256xf32>, vector<8x256xf32> -> vector<8x256xf32>
    %146 = arith.addf %134, %145 : vector<8x256xf32>
    %c4_56 = arith.constant 4 : index
    %c0_57 = arith.constant 0 : index
    %c0_58 = arith.constant 0 : index
    %147 = vector.load %arg3[%c4_56, %c0_57, %c0_58] : memref<9x8x8xf32, #tpu.memory_space<vmem>>, vector<1x8x8xf32>
    %148 = vector.shape_cast %147 : vector<1x8x8xf32> to vector<8x8xf32>
    %cst_59 = arith.constant dense<0.000000e+00> : vector<8x256xf32>
    %149 = tpu.matmul %148, %107, %cst_59 {dimension_numbers = #tpu.dot_dimension_numbers<[1], [0], [0], [1], [0, 0, 1, 1], [], []>} : vector<8x8xf32>, vector<8x256xf32>, vector<8x256xf32> -> vector<8x256xf32>
    %150 = arith.addf %146, %149 : vector<8x256xf32>
    %c5_60 = arith.constant 5 : index
    %c0_61 = arith.constant 0 : index
    %c0_62 = arith.constant 0 : index
    %151 = vector.load %arg3[%c5_60, %c0_61, %c0_62] : memref<9x8x8xf32, #tpu.memory_space<vmem>>, vector<1x8x8xf32>
    %152 = vector.shape_cast %151 : vector<1x8x8xf32> to vector<8x8xf32>
    %cst_63 = arith.constant dense<0.000000e+00> : vector<8x256xf32>
    %153 = tpu.matmul %152, %142, %cst_63 {dimension_numbers = #tpu.dot_dimension_numbers<[1], [0], [0], [1], [0, 0, 1, 1], [], []>} : vector<8x8xf32>, vector<8x256xf32>, vector<8x256xf32> -> vector<8x256xf32>
    %154 = arith.addf %150, %153 : vector<8x256xf32>
    %155 = vector.extract_strided_slice %115 {offsets = [0, 255], sizes = [8, 1], strides = [1, 1]} : vector<8x256xf32> to vector<8x1xf32>
    %156 = vector.extract_strided_slice %115 {offsets = [0, 0], sizes = [8, 255], strides = [1, 1]} : vector<8x256xf32> to vector<8x255xf32>
    %157 = tpu.concatenate %155, %156 in 1 : vector<8x1xf32>, vector<8x255xf32> -> vector<8x256xf32>
    %158 = vector.extract_strided_slice %115 {offsets = [0, 1], sizes = [8, 255], strides = [1, 1]} : vector<8x256xf32> to vector<8x255xf32>
    %159 = vector.extract_strided_slice %115 {offsets = [0, 0], sizes = [8, 1], strides = [1, 1]} : vector<8x256xf32> to vector<8x1xf32>
    %160 = tpu.concatenate %158, %159 in 1 : vector<8x255xf32>, vector<8x1xf32> -> vector<8x256xf32>
    %161 = arith.select %16, %160, %157 : vector<8x256xi1>, vector<8x256xf32>
    %162 = arith.select %18, %157, %160 : vector<8x256xi1>, vector<8x256xf32>
    %c6_64 = arith.constant 6 : index
    %c0_65 = arith.constant 0 : index
    %c0_66 = arith.constant 0 : index
    %163 = vector.load %arg3[%c6_64, %c0_65, %c0_66] : memref<9x8x8xf32, #tpu.memory_space<vmem>>, vector<1x8x8xf32>
    %164 = vector.shape_cast %163 : vector<1x8x8xf32> to vector<8x8xf32>
    %cst_67 = arith.constant dense<0.000000e+00> : vector<8x256xf32>
    %165 = tpu.matmul %164, %161, %cst_67 {dimension_numbers = #tpu.dot_dimension_numbers<[1], [0], [0], [1], [0, 0, 1, 1], [], []>} : vector<8x8xf32>, vector<8x256xf32>, vector<8x256xf32> -> vector<8x256xf32>
    %166 = arith.addf %154, %165 : vector<8x256xf32>
    %c7_68 = arith.constant 7 : index
    %c0_69 = arith.constant 0 : index
    %c0_70 = arith.constant 0 : index
    %167 = vector.load %arg3[%c7_68, %c0_69, %c0_70] : memref<9x8x8xf32, #tpu.memory_space<vmem>>, vector<1x8x8xf32>
    %168 = vector.shape_cast %167 : vector<1x8x8xf32> to vector<8x8xf32>
    %cst_71 = arith.constant dense<0.000000e+00> : vector<8x256xf32>
    %169 = tpu.matmul %168, %115, %cst_71 {dimension_numbers = #tpu.dot_dimension_numbers<[1], [0], [0], [1], [0, 0, 1, 1], [], []>} : vector<8x8xf32>, vector<8x256xf32>, vector<8x256xf32> -> vector<8x256xf32>
    %170 = arith.addf %166, %169 : vector<8x256xf32>
    %c8_72 = arith.constant 8 : index
    %c0_73 = arith.constant 0 : index
    %c0_74 = arith.constant 0 : index
    %171 = vector.load %arg3[%c8_72, %c0_73, %c0_74] : memref<9x8x8xf32, #tpu.memory_space<vmem>>, vector<1x8x8xf32>
    %172 = vector.shape_cast %171 : vector<1x8x8xf32> to vector<8x8xf32>
    %cst_75 = arith.constant dense<0.000000e+00> : vector<8x256xf32>
    %173 = tpu.matmul %172, %162, %cst_75 {dimension_numbers = #tpu.dot_dimension_numbers<[1], [0], [0], [1], [0, 0, 1, 1], [], []>} : vector<8x8xf32>, vector<8x256xf32>, vector<8x256xf32> -> vector<8x256xf32>
    %174 = arith.addf %170, %173 : vector<8x256xf32>
    %cst_76 = arith.constant dense<0.000000e+00> : vector<8xf32>
    %175 = vector.multi_reduction <add>, %174, %cst_76 [1] : vector<8x256xf32> to vector<8xf32>
    %176 = vector.shape_cast %175 : vector<8xf32> to vector<8x1xf32>
    %cst_77 = arith.constant 2.560000e+02 : f32
    %177 = vector.broadcast %cst_77 : f32 to vector<8x1xf32>
    %178 = arith.divf %176, %177 : vector<8x1xf32>
    %179 = vector.broadcast %178 : vector<8x1xf32> to vector<8x256xf32>
    %180 = arith.subf %174, %179 : vector<8x256xf32>
    %181 = arith.mulf %180, %180 : vector<8x256xf32>
    %cst_78 = arith.constant dense<0.000000e+00> : vector<8xf32>
    %182 = vector.multi_reduction <add>, %181, %cst_78 [1] : vector<8x256xf32> to vector<8xf32>
    %183 = vector.shape_cast %182 : vector<8xf32> to vector<8x1xf32>
    %cst_79 = arith.constant 2.560000e+02 : f32
    %184 = vector.broadcast %cst_79 : f32 to vector<8x1xf32>
    %185 = arith.divf %183, %184 : vector<8x1xf32>
    %cst_80 = arith.constant 9.99999974E-6 : f32
    %186 = vector.broadcast %cst_80 : f32 to vector<8x1xf32>
    %187 = arith.addf %185, %186 : vector<8x1xf32>
    %188 = math.rsqrt %187 : vector<8x1xf32>
    %189 = vector.broadcast %188 : vector<8x1xf32> to vector<8x256xf32>
    %190 = arith.mulf %180, %189 : vector<8x256xf32>
    %191 = vector.extract_strided_slice %190 {offsets = [0, 0], sizes = [4, 256], strides = [1, 1]} : vector<8x256xf32> to vector<4x256xf32>
    %192 = arith.addf %20, %191 : vector<4x256xf32>
    %c0_81 = arith.constant 0 : index
    %c0_82 = arith.constant 0 : index
    %c0_83 = arith.constant 0 : index
    %193 = vector.load %arg4[%c0_81, %c0_82, %c0_83] : memref<1x4x256xf32, #tpu.memory_space<vmem>>, vector<1x4x256xf32>
    %194 = vector.shape_cast %193 : vector<1x4x256xf32> to vector<4x256xf32>
    %195 = vector.shape_cast %192 : vector<4x256xf32> to vector<1x4x256xf32>
    tpu.vector_store %arg4[%c0_81, %c0_82, %c0_83], %195 {strides = array<i32>} : memref<1x4x256xf32, #tpu.memory_space<vmem>>, vector<1x4x256xf32>,
    return
  }
  func.func @transform_0(%arg0: i32) -> (i32, i32, i32) {
    %c0_i32 = arith.constant 0 : i32
    %c0_i32_0 = arith.constant 0 : i32
    %c0_i32_1 = arith.constant 0 : i32
    return %arg0, %c0_i32, %c0_i32_0 : i32, i32, i32
  }
  func.func @transform_1(%arg0: i32) -> (i32, i32, i32) {
    %c0_i32 = arith.constant 0 : i32
    %c0_i32_0 = arith.constant 0 : i32
    %c0_i32_1 = arith.constant 0 : i32
    %c0_i32_2 = arith.constant 0 : i32
    return %c0_i32, %c0_i32_0, %c0_i32_1 : i32, i32, i32
  }
  func.func @transform_2(%arg0: i32) -> (i32, i32, i32) {
    %c0_i32 = arith.constant 0 : i32
    %c0_i32_0 = arith.constant 0 : i32
    %c0_i32_1 = arith.constant 0 : i32
    %c0_i32_2 = arith.constant 0 : i32
    return %c0_i32, %c0_i32_0, %c0_i32_1 : i32, i32, i32
  }
  func.func @transform_3(%arg0: i32) -> (i32, i32, i32) {
    %c0_i32 = arith.constant 0 : i32
    %c0_i32_0 = arith.constant 0 : i32
    %c0_i32_1 = arith.constant 0 : i32
    return %arg0, %c0_i32, %c0_i32_0 : i32, i32, i32
  }
}

</mosaic_0001>

<bundles_post_ra>
// kernel: tpu_custom_call.1
= control target key start
LH: loop header
LB: loop body
LE: loop exit
PB: predicated region body
PF: predicated region fallthrough
CT: control target
= control target key end

     0   :  { %6 = vsyncpa [#allocation3], 0  ;;  %s127_s0 = inlined_call_operand.hbm [shape: f32[8,256], index: 0, kind: input, shape index: {}]   ;;  %s128_s1 = inlined_call_operand.hbm [shape: f32[8,256], index: 1, kind: output, shape index: {}]  }
   0x1   :  { %7 = vsyncpa [#allocation4], 0  ;;  %s13_s8 = sshll.u32 %s127_s0, 4  ;;  %s108_s9 = smov [#allocation2]   ;;  %s14_s8 = int_to_ptr.hbm [resolvable:$true] %s13_s8 }
   0x2   :  { %s15_s10 = sshll.u32 %s108_s9, 4  ;;  %s16_s10 = int_to_ptr.vmem [resolvable:$true] %s15_s10 }
   0x3   :  { %18 = dma.hbm_to_vmem [thread:$0]  %s14_s8, 256, %s16_s10, [#allocation3]  }
   0x4   :  { %104 = dma.done.wait [#allocation3], 256  }
   0x5   :  { %105 = vsyncadd [#allocation3], 4294967040  ;;  %v23_v0 = vld [vmem:[#allocation2] sm:$0xff]  ;;  %s109_s11 = smov 1   ;;  %v24_v1 = vld [vmem:[#allocation2 + $0x8] sm:$0xff]  ;;  %v29_v2 = vlaneseq  ;;  %s110_s12 = smov [#allocation5]  }
   0x6   :  { %25 = vrot.lane.b32.xlu0 %v23_v0, %s109_s11  ;;  %s41_s13 = sshll.u32 %s110_s12, 4  ;;  %s43_s15 = sshll.u32 %s128_s1, 4  ;;  %s42_s13 = int_to_ptr.vmem [resolvable:$true] %s41_s13  ;;  %s44_s15 = int_to_ptr.hbm [resolvable:$true] %s43_s15 }
   0x7   :  { %v30_v4 = vand.u32 127, %v29_v2 }
   0x9   :  { %vm31_vm0 = vcmp.lt.s32.totalorder %v30_v4, 1 }
   0xe   :  { %27 = vrot.lane.b32.xlu0 %v24_v1, %s109_s11 }
  0x78   :  { %v26_v3 = vpop.permute.xlu0 %25 }
  0x80   :  { %v28_v5 = vpop.permute.xlu0 %27 }
  0x81   :  { %v32_v6 = vsel %vm31_vm0, %v26_v3, %v28_v5  ;;  %v33_v7 = vsel %vm31_vm0, %v28_v5, %v26_v3 }
  0x82   :  { %34 = vst [vmem:[#allocation5] sm:$0xff] %v33_v7 }
  0x83   :  { %35 = vst [vmem:[#allocation5 + $0x8] sm:$0xff] %v32_v6 }
  0x84   :  { %46 = dma.vmem_to_hbm [thread:$0]  %s42_s13, 256, %s44_s15, [#allocation4]  }
  0x85   :  { %106 = dma.done.wait [#allocation4], 256  }
  0x86   :  { %107 = vsyncadd [#allocation4], 4294967040 }
  0x87   :  { %51 = vsyncpa [#allocation3], 1 }
  0x88   :  { %52 = vsyncpa [#allocation4], 1 }

// kernel: _residual_block.1
= control target key start
LH: loop header
LB: loop body
LE: loop exit
PB: predicated region body
PF: predicated region fallthrough
CT: control target
= control target key end

     0   :  { %s1570_s12 = smov 0   ;;  %s1857_s0 = inlined_call_operand.vmem [shape: f32[2,4,256], index: 0, kind: input, shape index: {}]   ;;  %s1858_s1 = inlined_call_operand.vmem [shape: f32[9,8,8], index: 1, kind: input, shape index: {}]   ;;  %s1859_s2 = inlined_call_operand.vmem [shape: f32[9,8,8], index: 2, kind: input, shape index: {}]   ;;  %s1860_s3 = inlined_call_operand.vmem [shape: f32[2,4,256], index: 3, kind: output, shape index: {}]  }
   0x1 LB: > { %s1363_s13 = sadd.s32 4294967295, %s1542_s12   ;;  %p1367_p0 = scmp.ge.s32.totalorder %s1542_s12, 1  ;;  %s1542_s12 = sphi %s1570_s12, %s13_s12  }
   0x2   : > { %p137_p1 = scmp.lt.s32.totalorder %s1542_s12, 3 }
   0x4   : > { %p138_p2 = pnand %p1367_p0, %p137_p1 }
   0x5   : > { %p161_p3 = scmp.lt.s32.totalorder (!%p138_p2), %s1363_s13, 1  ;;  %s1544_s18 = smov (!%p138_p2), 16  }
   0x6   : > { %141 = sbr.rel (%p138_p2) target bundleno = 1404 (0x57c), region = 32  ;;  %s1545_s19 = smov (!%p138_p2), 112  }
   0x7   : > { %s1547_s20 = smov (!%p138_p2), 1   ;;  %s1548_s21 = smov (!%p138_p2), 127  }
   0xb   : > { %s1864_s13 = smov (!%p161_p3, %s1363_s13), 1  ;;  %vm1861_vm0 = vcmask 1043456   ;;  %v1546_v7 = vmov 16.0   ;;  %v171_v9 = vlaneseq  ;;  %vm220_vm3 = vcmask 130048   ;;  %v1372_v45 = vld [vmem:[%s1858_s1 + $0x8] sm:$0xff] }
   0xc   : > { %s1428_s14 = sshll.u32 %s1864_s13, 3  ;;  %1528 = vrcp.f32 %v1546_v7  ;;  %vm229_vm4 = vcmask 916480   ;;  %vm268_vm8 = vcmask 64512   ;;  %vm255_vm9 = vcmask 1039360  }
   0xd   : > { %s165_s17 = scalar_lea.vmem %s1857_s0, %s1428_s14  ;;  %v172_v11 = vand.u32 127, %v171_v9  ;;  %vm246_vm11 = vcmask 7168   ;;  %s170_s9 = scalar_lea.vmem %s1860_s3, %s1428_s14 }
   0xe   : > { %v1586_v0 = vld [vmem:[%s165_s17] sm:$0xff] }
   0xf   : > { %205 = vst [vmem:[#allocation1] ss:$2 sm:$0xff] %v1586_v0  ;;  %v173_v13 = vadd.s32 128, %v172_v11  ;;  %v174_v15 = vcvt.s32.f32 %v172_v11 }
  0x11   : > { %v175_v16 = vcvt.s32.f32 %v173_v13  ;;  %v176_v18 = vadd.f32 0.5, %v174_v15  ;;  %v1377_v15 = vld [vmem:[%s1858_s1 + $0x10] sm:$0xff] }
  0x12   : > { %v1529_v8 = vpop.eup %1528 }
  0x13   : > { %v179_v10 = vmul.f32 16.0, %v1529_v8  ;;  %vm183_vm1 = vweird.f32 %v1529_v8  ;;  %v177_v19 = vadd.f32 0.5, %v175_v16 }
  0x15   : > { %v180_v12 = vsub.f32 1.0, %v179_v10 }
  0x16   : > { %v1589_v1 = vld.sshfl [vmem:[#allocation1] sm:$0xff pattern:$0x75316420]  ;;  %v1591_v2 = vld.sshfl [vmem:[#allocation1 + $0x8] sm:$0xff pattern:$0x75316420] }
  0x17   : > { %v211_v3 = vsel %vm1861_vm0, %v1589_v1, 0.0  ;;  %v212_v4 = vsel %vm1861_vm0, %v1591_v2, 0.0  ;;  %v181_v14 = vmul.f32 %v1529_v8, %v180_v12 }
  0x18   : > { %v1448_v5 = vpack.i.bf16 %v211_v3, %v212_v4  ;;  %v1453_v6 = vpack.i.bf16 %v212_v4, %v211_v3 }
  0x19   : > { %v182_v17 = vadd.f32 %v1529_v8, %v181_v14  ;;  %v265_v14 = vld [vmem:[%s1858_s1] sm:$0xff] }
  0x1a   : > { %1449 = vrot.lane.b32.xlu0 %v1448_v5, %s1544_s18  ;;  %1469 = vrot.lane.b32.xlu2 %v1448_v5, %s1547_s20 }
  0x1b   : > { %v184_v20 = vsel %vm183_vm1, %v1529_v8, %v182_v17 }
  0x1c   : > { %v185_v21 = vmul.f32 %v184_v20, %v176_v18  ;;  %v186_v22 = vmul.f32 %v184_v20, %v177_v19 }
  0x1e   : > { %v187_v24 = vfloor.f32 %v185_v21  ;;  %v188_v25 = vfloor.f32 %v186_v22 }
  0x20   : > { %v1600_v26 = vcvt.f32.s32 %v187_v24  ;;  %v1602_v27 = vcvt.f32.s32 %v188_v25 }
  0x22   : > { %1454 = vrot.lane.b32.xlu0 %v1453_v6, %s1545_s19  ;;  %vm195_vm2 = vcmp.eq.s32.totalorder %v1600_v26, 0  ;;  %vm196_vm5 = vcmp.eq.s32.totalorder %v1602_v27, 0  ;;  %vm197_vm6 = vcmp.eq.s32.totalorder %v1600_v26, 15  ;;  %vm198_vm7 = vcmp.eq.s32.totalorder %v1602_v27, 15  ;;  %1474 = vrot.lane.b32.xlu2 %v1453_v6, %s1548_s21 }
  0x23   : > { %v191_v48 = vmul.u32 16, %v1600_v26  ;;  %v192_v49 = vmul.u32 16, %v1602_v27  ;;  %v1400_v27 = vld [vmem:[%s1859_s2 + $0x8] sm:$0xff] }
  0x25   : > { %v1640_v51 = vsub.s32 %v172_v11, %v191_v48  ;;  %v1642_v52 = vsub.s32 %v173_v13, %v192_v49 }
  0x27   : > { %vm199_vm10 = vcmp.eq.s32.totalorder %v1640_v51, 0  ;;  %vm200_vm12 = vcmp.eq.s32.totalorder %v1642_v52, 0  ;;  %vm201_vm13 = vcmp.eq.s32.totalorder %v1640_v51, 15  ;;  %vm202_vm14 = vcmp.eq.s32.totalorder %v1642_v52, 15  ;;  %v1420_v51 = vld [vmem:[%s1859_s2 + $0x38] sm:$0xff]  ;;  %v1423_v52 = vld [vmem:[%s1859_s2 + $0x40] sm:$0xff] }
  0x74   : > { %v1470_v46 = vpop.permute.xlu2 %1469 }
  0x75   : > { %v1472_v53 = vunpack.i.h.bf16 %v1470_v46  ;;  %v1471_v54 = vunpack.i.l.bf16 %v1470_v46 }
  0x77   : > { %v410_v62 = vsel %vm246_vm11, %v1471_v54, %v1472_v53  ;;  %v407_v3 = vsel %vm246_vm11, %v1472_v53, %v1471_v54 }
  0x7c   : > { %v1475_v50 = vpop.permute.xlu2 %1474 }
  0x7d   : > { %v1477_v55 = vunpack.i.h.bf16 %v1475_v50  ;;  %v1476_v56 = vunpack.i.l.bf16 %v1475_v50 }
  0x7f   : > { %v415_v63 = vsel %vm255_vm9, %v1476_v56, %v1477_v55  ;;  %v419_v4 = vsel %vm255_vm9, %v1477_v55, %v1476_v56 }
  0x80   : > { %v420_v18 = vsel %vm199_vm10, %v415_v63, %v410_v62  ;;  %v421_v19 = vsel %vm200_vm12, %v419_v4, %v407_v3  ;;  %v422_v21 = vsel %vm201_vm13, %v410_v62, %v415_v63  ;;  %v423_v22 = vsel %vm202_vm14, %v407_v3, %v419_v4 }
  0x8c   : > { %v1450_v23 = vpop.permute.xlu0 %1449 }
  0x8d   : > { %v1452_v28 = vunpack.i.h.bf16 %v1450_v23  ;;  %v1451_v29 = vunpack.i.l.bf16 %v1450_v23 }
  0x8f   : > { %v224_v33 = vsel %vm220_vm3, %v1451_v29, %v1452_v28  ;;  %v221_v35 = vsel %vm220_vm3, %v1452_v28, %v1451_v29 }
  0x94   : > { %v1455_v30 = vpop.permute.xlu0 %1454 }
  0x95   : > { %v1457_v31 = vunpack.i.h.bf16 %v1455_v30  ;;  %v1456_v32 = vunpack.i.l.bf16 %v1455_v30 }
  0x97   : > { %v230_v34 = vsel %vm229_vm4, %v1456_v32, %v1457_v31  ;;  %v234_v36 = vsel %vm229_vm4, %v1457_v31, %v1456_v32 }
  0x98   : > { %v235_v37 = vsel %vm195_vm2, %v230_v34, %v224_v33  ;;  %v236_v38 = vsel %vm196_vm5, %v234_v36, %v221_v35  ;;  %v1619_v39 = vsel %vm197_vm6, %v224_v33, %v230_v34  ;;  %v1623_v40 = vsel %vm198_vm7, %v221_v35, %v234_v36  ;;  %v1380_v33 = vld [vmem:[%s1858_s1 + $0x18] sm:$0xff]  ;;  %v1388_v35 = vld [vmem:[%s1858_s1 + $0x28] sm:$0xff]  ;;  %v1391_v36 = vld [vmem:[%s1858_s1 + $0x30] sm:$0xff] }
  0x99   : > { %287 = vmatpush.msra.mxu0 %v235_v37  ;;  %307 = vmatpush.msra.mxu1 %v236_v38  ;;  %v1478_v41 = vpack.i.bf16 %v1619_v39, %v1623_v40  ;;  %v1458_v42 = vpack.i.bf16 %v235_v37, %v236_v38  ;;  %v1463_v43 = vpack.i.bf16 %v236_v38, %v235_v37  ;;  %v1394_v37 = vld [vmem:[%s1858_s1 + $0x38] sm:$0xff]  ;;  %v1397_v38 = vld [vmem:[%s1858_s1 + $0x40] sm:$0xff] }
  0x9a   : > { %v1483_v44 = vpack.i.bf16 %v1623_v40, %v1619_v39  ;;  %1373 = vmatmul.msk.f32.vlgmr.msra.gmra.mxu0 %vm268_vm8, %v1372_v45  ;;  %1374 = vmatmul.msk.f32.vlgmr.msra.gmra.mxu1 %vm268_vm8, %v1372_v45 }
  0x9b   : > { %1479 = vrot.lane.b32.xlu0 %v1478_v41, %s1547_s20  ;;  %1459 = vrot.lane.b32.xlu1 %v1458_v42, %s1547_s20 }
  0xa3   : > { %1464 = vrot.lane.b32.xlu1 %v1463_v43, %s1548_s21 }
  0xab   : > { %1484 = vrot.lane.b32.xlu1 %v1483_v44, %s1548_s21 }
 0x10d   : > { %v1460_v47 = vpop.permute.xlu1 %1459  ;;  %v1480_v5 = vpop.permute.xlu0 %1479 }
 0x10e   : > { %v1462_v57 = vunpack.i.h.bf16 %v1460_v47  ;;  %v1461_v58 = vunpack.i.l.bf16 %v1460_v47  ;;  %v1482_v16 = vunpack.i.h.bf16 %v1480_v5  ;;  %v1481_v17 = vunpack.i.l.bf16 %v1480_v5 }
 0x110   : > { %v250_v6 = vsel %vm246_vm11, %v1461_v58, %v1462_v57  ;;  %v247_v8 = vsel %vm246_vm11, %v1462_v57, %v1461_v58  ;;  %v575_v25 = vsel %vm246_vm11, %v1481_v17, %v1482_v16  ;;  %v572_v29 = vsel %vm246_vm11, %v1482_v16, %v1481_v17 }
 0x115   : > { %v1465_v59 = vpop.permute.xlu1 %1464 }
 0x116   : > { %v1467_v60 = vunpack.i.h.bf16 %v1465_v59  ;;  %v1466_v61 = vunpack.i.l.bf16 %v1465_v59 }
 0x118   : > { %v256_v7 = vsel %vm255_vm9, %v1466_v61, %v1467_v60  ;;  %v260_v9 = vsel %vm255_vm9, %v1467_v60, %v1466_v61 }
 0x119   : > { %v261_v10 = vsel %vm199_vm10, %v256_v7, %v250_v6  ;;  %v262_v11 = vsel %vm200_vm12, %v260_v9, %v247_v8  ;;  %v263_v12 = vsel %vm201_vm13, %v250_v6, %v256_v7  ;;  %v264_v13 = vsel %vm202_vm14, %v247_v8, %v260_v9 }
 0x11a   : > { %330 = vmatpush.msra.mxu2 %v261_v10  ;;  %350 = vmatpush.msra.mxu3 %v262_v11 }
 0x11b   : > { %375 = vmatpush.msrb.mxu0 %v263_v12  ;;  %395 = vmatpush.msrb.mxu1 %v264_v13 }
 0x11c   : > { %1375 = vmatmul.msk.f32.vlgmr.msra.gmra.mxu2 %vm268_vm8, %v265_v14  ;;  %1376 = vmatmul.msk.f32.vlgmr.msra.gmra.mxu3 %vm268_vm8, %v265_v14 }
 0x11d   : > { %1378 = vmatmul.msk.f32.vlgmr.msrb.gmra.mxu0 %vm268_vm8, %v1377_v15  ;;  %1379 = vmatmul.msk.f32.vlgmr.msrb.gmra.mxu1 %vm268_vm8, %v1377_v15  ;;  %v1485_v20 = vpop.permute.xlu1 %1484  ;;  %v1549_v15 = vmov 256.0  }
 0x11e   : > { %444 = vmatpush.msrb.mxu2 %v420_v18  ;;  %464 = vmatpush.msrb.mxu3 %v421_v19  ;;  %v1487_v23 = vunpack.i.h.bf16 %v1485_v20  ;;  %v1486_v24 = vunpack.i.l.bf16 %v1485_v20  ;;  %1530 = vrcp.f32 %v1549_v15 }
 0x11f   : > { %1384 = vmatpush.msk.msra.mxu0 %vm1861_vm0, %v1589_v1  ;;  %1386 = vmatpush.msk.msra.mxu1 %vm1861_vm0, %v1591_v2  ;;  %v1383_v1 = vld [vmem:[%s1858_s1 + $0x20] sm:$0xff] }
 0x120   : > { %538 = vmatpush.msra.mxu2 %v422_v21  ;;  %558 = vmatpush.msra.mxu3 %v423_v22  ;;  %v580_v28 = vsel %vm255_vm9, %v1486_v24, %v1487_v23  ;;  %v584_v30 = vsel %vm255_vm9, %v1487_v23, %v1486_v24 }
 0x121   : > { %v585_v31 = vsel %vm199_vm10, %v580_v28, %v575_v25  ;;  %v586_v32 = vsel %vm200_vm12, %v584_v30, %v572_v29  ;;  %v587_v2 = vsel %vm201_vm13, %v575_v25, %v580_v28  ;;  %v588_v34 = vsel %vm202_vm14, %v572_v29, %v584_v30 }
 0x122   : > { %609 = vmatpush.msrb.mxu0 %v585_v31  ;;  %629 = vmatpush.msrb.mxu1 %v586_v32 }
 0x124   : > { %1381 = vmatmul.msk.f32.vlgmr.msrb.gmra.mxu2 %vm268_vm8, %v1380_v33  ;;  %1382 = vmatmul.msk.f32.vlgmr.msrb.gmra.mxu3 %vm268_vm8, %v1380_v33  ;;  %v1531_v16 = vpop.eup %1530 }
 0x125   : > { %1385 = vmatmul.msk.f32.vlgmr.msra.gmra.mxu0 %vm268_vm8, %v1383_v1  ;;  %1387 = vmatmul.msk.f32.vlgmr.msra.gmra.mxu1 %vm268_vm8, %v1383_v1  ;;  %v734_v17 = vmul.f32 256.0, %v1531_v16  ;;  %vm738_vm15 = vweird.f32 %v1531_v16 }
 0x126   : > { %656 = vmatpush.msrb.mxu2 %v1619_v39  ;;  %676 = vmatpush.msrb.mxu3 %v1623_v40  ;;  %v289_v39 = vpop.f32.mrf.mxu0  ;;  %v309_v40 = vpop.f32.mrf.mxu1 }
 0x127   : > { %703 = vmatpush.msra.mxu0 %v587_v2  ;;  %723 = vmatpush.msra.mxu1 %v588_v34  ;;  %v735_v18 = vsub.f32 1.0, %v734_v17 }
 0x129   : > { %v736_v19 = vmul.f32 %v1531_v16, %v735_v18  ;;  %v812_v18 = vld [vmem:[%s1859_s2] sm:$0xff] }
 0x12b   : > { %v737_v20 = vadd.f32 %v1531_v16, %v736_v19  ;;  %v1405_v19 = vld [vmem:[%s1859_s2 + $0x10] sm:$0xff] }
 0x12c   : > { %1389 = vmatmul.msk.f32.vlgmr.msra.gmra.mxu2 %vm268_vm8, %v1388_v35  ;;  %1390 = vmatmul.msk.f32.vlgmr.msra.gmra.mxu3 %vm268_vm8, %v1388_v35 }
 0x12d   : > { %1392 = vmatmul.msk.f32.vlgmr.msrb.gmra.mxu0 %vm268_vm8, %v1391_v36  ;;  %1393 = vmatmul.msk.f32.vlgmr.msrb.gmra.mxu1 %vm268_vm8, %v1391_v36  ;;  %v1730_v21 = vsel %vm738_vm15, %v1531_v16, %v737_v20 }
 0x134   : > { %1395 = vmatmul.msk.f32.vlgmr.msrb.gmra.mxu2 %vm268_vm8, %v1394_v37  ;;  %1396 = vmatmul.msk.f32.vlgmr.msrb.gmra.mxu3 %vm268_vm8, %v1394_v37 }
 0x135   : > { %1398 = vmatmul.msk.f32.vlgmr.msra.gmra.mxu0 %vm268_vm8, %v1397_v38  ;;  %1399 = vmatmul.msk.f32.vlgmr.msra.gmra.mxu1 %vm268_vm8, %v1397_v38 }
 0x19a   : > { %v377_v41 = vpop.f32.mrf.mxu0  ;;  %v397_v42 = vpop.f32.mrf.mxu1 }
 0x19f   : > { %v332_v43 = vpop.f32.mrf.mxu2  ;;  %v352_v44 = vpop.f32.mrf.mxu3 }
 0x1a0   : > { %v333_v47 = vadd.f32 %v332_v43, %v289_v39  ;;  %v353_v48 = vadd.f32 %v352_v44, %v309_v40 }
 0x1a2   : > { %v493_v45 = vpop.f32.mrf.mxu0  ;;  %v513_v46 = vpop.f32.mrf.mxu1  ;;  %v400_v53 = vadd.f32 %v377_v41, %v333_v47  ;;  %v401_v54 = vadd.f32 %v397_v42, %v353_v48 }
 0x1a7   : > { %v446_v49 = vpop.f32.mrf.mxu2  ;;  %v466_v50 = vpop.f32.mrf.mxu3 }
 0x1a8   : > { %v469_v55 = vadd.f32 %v446_v49, %v400_v53  ;;  %v470_v56 = vadd.f32 %v466_v50, %v401_v54 }
 0x1aa   : > { %v611_v57 = vpop.f32.mrf.mxu0  ;;  %v631_v58 = vpop.f32.mrf.mxu1  ;;  %v516_v61 = vadd.f32 %v493_v45, %v469_v55  ;;  %v517_v62 = vadd.f32 %v513_v46, %v470_v56 }
 0x1af   : > { %v540_v59 = vpop.f32.mrf.mxu2  ;;  %v560_v60 = vpop.f32.mrf.mxu3 }
 0x1b0   : > { %v563_v63 = vadd.f32 %v540_v59, %v516_v61  ;;  %v564_v3 = vadd.f32 %v560_v60, %v517_v62 }
 0x1b2   : > { %v634_v4 = vadd.f32 %v611_v57, %v563_v63  ;;  %v635_v5 = vadd.f32 %v631_v58, %v564_v3  ;;  %v705_v6 = vpop.f32.mrf.mxu0  ;;  %v725_v7 = vpop.f32.mrf.mxu1 }
 0x1b7   : > { %v658_v8 = vpop.f32.mrf.mxu2  ;;  %v678_v9 = vpop.f32.mrf.mxu3 }
 0x1b8   : > { %v681_v10 = vadd.f32 %v658_v8, %v634_v4  ;;  %v682_v11 = vadd.f32 %v678_v9, %v635_v5 }
 0x1ba   : > { %v728_v12 = vadd.f32 %v705_v6, %v681_v10  ;;  %v729_v13 = vadd.f32 %v725_v7, %v682_v11 }
 0x1bc   : > { %v730_v14 = vadd.f32 %v729_v13, %v728_v12 }
 0x1be   : > { %731 = vadd.xlane.f32.xlu2 %v730_v14 }
 0x231   : > { %v732_v22 = vpop.xlane.xlu2 %731 }
 0x232   : > { %v740_v23 = vmul.f32 %v1730_v21, %v732_v22 }
 0x234   : > { %v741_v24 = vsub.f32 %v728_v12, %v740_v23  ;;  %v742_v25 = vsub.f32 %v729_v13, %v740_v23 }
 0x236   : > { %v743_v28 = vmul.f32 %v741_v24, %v741_v24  ;;  %v744_v29 = vmul.f32 %v742_v25, %v742_v25 }
 0x238   : > { %v745_v30 = vadd.f32 %v744_v29, %v743_v28 }
 0x23a   : > { %746 = vadd.xlane.f32.xlu0 %v745_v30 }
 0x2ad   : > { %v747_v31 = vpop.xlane.xlu0 %746 }
 0x2ae   : > { %v748_v32 = vmul.f32 %v747_v31, %v1730_v21 }
 0x2b0   : > { %v749_v33 = vadd.f32 1e-05, %v748_v32 }
 0x2b2   : > { %1532 = vrsqrt.f32 %v749_v33  ;;  %vm756_vm15 = vweird.f32 %v749_v33 }
 0x2b8   : > { %v1533_v1 = vpop.eup %1532 }
 0x2b9   : > { %v751_v2 = vmul.f32 %v1533_v1, %v749_v33  ;;  %vm757_vm1 = vweird.f32 %v1533_v1 }
 0x2ba   : > { %vm758_vm0 = vmor %vm756_vm15, %vm757_vm1 }
 0x2bb   : > { %v752_v34 = vmul.f32 %v1533_v1, %v751_v2  ;;  %v1408_v2 = vld [vmem:[%s1859_s2 + $0x18] sm:$0xff] }
 0x2bd   : > { %v753_v35 = vmul.f32 0.5, %v752_v34 }
 0x2bf   : > { %v754_v36 = vsub.f32 1.5, %v753_v35 }
 0x2c1   : > { %v755_v37 = vmul.f32 %v1533_v1, %v754_v36  ;;  %v1411_v36 = vld [vmem:[%s1859_s2 + $0x20] sm:$0xff] }
 0x2c3   : > { %v759_v38 = vsel %vm758_vm0, %v1533_v1, %v755_v37 }
 0x2c4   : > { %v760_v39 = vmul.f32 %v759_v38, %v741_v24  ;;  %v761_v40 = vmul.f32 %v759_v38, %v742_v25 }
 0x2c6   : > { %v762_v41 = vmax.f32 %v760_v39, 0.0  ;;  %v763_v42 = vmax.f32 %v761_v40, 0.0 }
 0x2c8   : > { %v1513_v43 = vpack.i.bf16 %v763_v42, %v762_v41  ;;  %v1488_v44 = vpack.i.bf16 %v762_v41, %v763_v42 }
 0x2ca   : > { %1514 = vrot.lane.b32.xlu2 %v1513_v43, %s1548_s21  ;;  %1489 = vrot.lane.b32.xlu1 %v1488_v44, %s1544_s18 }
 0x2d2   : > { %1494 = vrot.lane.b32.xlu1 %v1513_v43, %s1545_s19 }
 0x324   : > { %v1515_v13 = vpop.permute.xlu2 %1514 }
 0x325   : > { %v1517_v20 = vunpack.i.h.bf16 %v1515_v13  ;;  %v1516_v22 = vunpack.i.l.bf16 %v1515_v13 }
 0x327   : > { %v961_v29 = vsel %vm255_vm9, %v1516_v22, %v1517_v20  ;;  %v965_v31 = vsel %vm255_vm9, %v1517_v20, %v1516_v22 }
 0x33c   : > { %v1490_v45 = vpop.permute.xlu1 %1489 }
 0x33d   : > { %v1492_v46 = vunpack.i.h.bf16 %v1490_v45  ;;  %v1491_v47 = vunpack.i.l.bf16 %v1490_v45 }
 0x33f   : > { %v774_v53 = vsel %vm220_vm3, %v1491_v47, %v1492_v46  ;;  %v771_v55 = vsel %vm220_vm3, %v1492_v46, %v1491_v47 }
 0x344   : > { %v1495_v48 = vpop.permute.xlu1 %1494 }
 0x345   : > { %v1497_v49 = vunpack.i.h.bf16 %v1495_v48  ;;  %v1496_v50 = vunpack.i.l.bf16 %v1495_v48  ;;  %v1414_v48 = vld [vmem:[%s1859_s2 + $0x28] sm:$0xff] }
 0x347   : > { %v779_v54 = vsel %vm229_vm4, %v1496_v50, %v1497_v49  ;;  %v783_v56 = vsel %vm229_vm4, %v1497_v49, %v1496_v50  ;;  %vm1862_vm4 = vcmask 1043456  }
 0x348   : > { %v784_v57 = vsel %vm195_vm2, %v779_v54, %v774_v53  ;;  %v785_v58 = vsel %vm196_vm5, %v783_v56, %v771_v55  ;;  %v1747_v59 = vsel %vm197_vm6, %v774_v53, %v779_v54  ;;  %v1751_v60 = vsel %vm198_vm7, %v771_v55, %v783_v56  ;;  %v1417_v53 = vld [vmem:[%s1859_s2 + $0x30] sm:$0xff] }
 0x349   : > { %833 = vmatpush.msra.mxu2 %v784_v57  ;;  %853 = vmatpush.msra.mxu3 %v785_v58  ;;  %v1523_v61 = vpack.i.bf16 %v1751_v60, %v1747_v59  ;;  %v1498_v62 = vpack.i.bf16 %v784_v57, %v785_v58  ;;  %v1503_v63 = vpack.i.bf16 %v785_v58, %v784_v57 }
 0x34a   : > { %v1518_v26 = vpack.i.bf16 %v1747_v59, %v1751_v60  ;;  %1401 = vmatmul.msk.f32.vlgmr.msra.gmra.mxu2 %vm268_vm8, %v1400_v27  ;;  %1402 = vmatmul.msk.f32.vlgmr.msra.gmra.mxu3 %vm268_vm8, %v1400_v27 }
 0x34b   : > { %1524 = vrot.lane.b32.xlu0 %v1523_v61, %s1548_s21  ;;  %1499 = vrot.lane.b32.xlu1 %v1498_v62, %s1547_s20 }
 0x353   : > { %1504 = vrot.lane.b32.xlu1 %v1503_v63, %s1548_s21 }
 0x35b   : > { %1509 = vrot.lane.b32.xlu1 %v1488_v44, %s1547_s20 }
 0x363   : > { %1519 = vrot.lane.b32.xlu1 %v1518_v26, %s1547_s20 }
 0x3bd   : > { %v1500_v3 = vpop.permute.xlu1 %1499  ;;  %v1525_v32 = vpop.permute.xlu0 %1524 }
 0x3be   : > { %v1502_v4 = vunpack.i.h.bf16 %v1500_v3  ;;  %v1501_v5 = vunpack.i.l.bf16 %v1500_v3  ;;  %v1527_v37 = vunpack.i.h.bf16 %v1525_v32  ;;  %v1526_v38 = vunpack.i.l.bf16 %v1525_v32 }
 0x3c0   : > { %v798_v9 = vsel %vm246_vm11, %v1501_v5, %v1502_v4  ;;  %v795_v11 = vsel %vm246_vm11, %v1502_v4, %v1501_v5  ;;  %v1130_v43 = vsel %vm255_vm9, %v1527_v37, %v1526_v38 }
 0x3c5   : > { %v1505_v6 = vpop.permute.xlu1 %1504 }
 0x3c6   : > { %v1507_v7 = vunpack.i.h.bf16 %v1505_v6  ;;  %v1506_v8 = vunpack.i.l.bf16 %v1505_v6 }
 0x3c8   : > { %v803_v10 = vsel %vm255_vm9, %v1506_v8, %v1507_v7  ;;  %v807_v12 = vsel %vm255_vm9, %v1507_v7, %v1506_v8 }
 0x3c9   : > { %v808_v14 = vsel %vm199_vm10, %v803_v10, %v798_v9  ;;  %v809_v15 = vsel %vm200_vm12, %v807_v12, %v795_v11  ;;  %v810_v16 = vsel %vm201_vm13, %v798_v9, %v803_v10  ;;  %v811_v17 = vsel %vm202_vm14, %v795_v11, %v807_v12 }
 0x3ca   : > { %876 = vmatpush.msrb.mxu0 %v808_v14  ;;  %896 = vmatpush.msrb.mxu1 %v809_v15 }
 0x3cb   : > { %921 = vmatpush.msrb.mxu2 %v810_v16  ;;  %941 = vmatpush.msrb.mxu3 %v811_v17 }
 0x3cc   : > { %1403 = vmatmul.msk.f32.vlgmr.msrb.gmra.mxu0 %vm268_vm8, %v812_v18  ;;  %1404 = vmatmul.msk.f32.vlgmr.msrb.gmra.mxu1 %vm268_vm8, %v812_v18 }
 0x3cd   : > { %1406 = vmatmul.msk.f32.vlgmr.msrb.gmra.mxu2 %vm268_vm8, %v1405_v19  ;;  %1407 = vmatmul.msk.f32.vlgmr.msrb.gmra.mxu3 %vm268_vm8, %v1405_v19  ;;  %v1510_v23 = vpop.permute.xlu1 %1509  ;;  %v835_v54 = vpop.f32.mrf.mxu2 }
 0x3ce   : > { %1037 = vmatpush.msra.mxu2 %v762_v41  ;;  %1057 = vmatpush.msra.mxu3 %v763_v42  ;;  %v1512_v24 = vunpack.i.h.bf16 %v1510_v23  ;;  %v1511_v25 = vunpack.i.l.bf16 %v1510_v23  ;;  %v1126_v42 = vsel %vm255_vm9, %v1526_v38, %v1527_v37  ;;  %v855_v55 = vpop.f32.mrf.mxu3 }
 0x3d0   : > { %v956_v28 = vsel %vm246_vm11, %v1511_v25, %v1512_v24  ;;  %v953_v30 = vsel %vm246_vm11, %v1512_v24, %v1511_v25 }
 0x3d1   : > { %v966_v33 = vsel %vm199_vm10, %v961_v29, %v956_v28  ;;  %v967_v1 = vsel %vm200_vm12, %v965_v31, %v953_v30  ;;  %v968_v34 = vsel %vm201_vm13, %v956_v28, %v961_v29  ;;  %v969_v35 = vsel %vm202_vm14, %v953_v30, %v965_v31 }
 0x3d2   : > { %990 = vmatpush.msra.mxu0 %v966_v33  ;;  %1010 = vmatpush.msra.mxu1 %v967_v1 }
 0x3d4   : > { %1084 = vmatpush.msrb.mxu0 %v968_v34  ;;  %1104 = vmatpush.msrb.mxu1 %v969_v35 }
 0x3d5   : > { %1409 = vmatmul.msk.f32.vlgmr.msra.gmra.mxu0 %vm268_vm8, %v1408_v2  ;;  %1410 = vmatmul.msk.f32.vlgmr.msra.gmra.mxu1 %vm268_vm8, %v1408_v2  ;;  %v1520_v39 = vpop.permute.xlu1 %1519 }
 0x3d6   : > { %1412 = vmatmul.msk.f32.vlgmr.msra.gmra.mxu2 %vm268_vm8, %v1411_v36  ;;  %1413 = vmatmul.msk.f32.vlgmr.msra.gmra.mxu3 %vm268_vm8, %v1411_v36  ;;  %v1522_v40 = vunpack.i.h.bf16 %v1520_v39  ;;  %v1521_v41 = vunpack.i.l.bf16 %v1520_v39 }
 0x3d7   : > { %1202 = vmatpush.msra.mxu0 %v1747_v59  ;;  %1222 = vmatpush.msra.mxu1 %v1751_v60 }
 0x3d8   : > { %v1121_v44 = vsel %vm246_vm11, %v1521_v41, %v1522_v40  ;;  %v1118_v45 = vsel %vm246_vm11, %v1522_v40, %v1521_v41 }
 0x3d9   : > { %v1131_v46 = vsel %vm199_vm10, %v1126_v42, %v1121_v44  ;;  %v1132_v47 = vsel %vm200_vm12, %v1130_v43, %v1118_v45  ;;  %v1133_v49 = vsel %vm201_vm13, %v1121_v44, %v1126_v42  ;;  %v1134_v50 = vsel %vm202_vm14, %v1118_v45, %v1130_v43 }
 0x3da   : > { %1155 = vmatpush.msrb.mxu2 %v1131_v46  ;;  %1175 = vmatpush.msrb.mxu3 %v1132_v47 }
 0x3dc   : > { %1249 = vmatpush.msra.mxu2 %v1133_v49  ;;  %1269 = vmatpush.msra.mxu3 %v1134_v50 }
 0x3dd   : > { %1415 = vmatmul.msk.f32.vlgmr.msrb.gmra.mxu0 %vm268_vm8, %v1414_v48  ;;  %1416 = vmatmul.msk.f32.vlgmr.msrb.gmra.mxu1 %vm268_vm8, %v1414_v48 }
 0x3de   : > { %1418 = vmatmul.msk.f32.vlgmr.msrb.gmra.mxu2 %vm268_vm8, %v1417_v53  ;;  %1419 = vmatmul.msk.f32.vlgmr.msrb.gmra.mxu3 %vm268_vm8, %v1417_v53 }
 0x3e5   : > { %1421 = vmatmul.msk.f32.vlgmr.msra.gmra.mxu0 %vm268_vm8, %v1420_v51  ;;  %1422 = vmatmul.msk.f32.vlgmr.msra.gmra.mxu1 %vm268_vm8, %v1420_v51 }
 0x3e6   : > { %1424 = vmatmul.msk.f32.vlgmr.msra.gmra.mxu2 %vm268_vm8, %v1423_v52  ;;  %1425 = vmatmul.msk.f32.vlgmr.msra.gmra.mxu3 %vm268_vm8, %v1423_v52 }
 0x449   : > { %v878_v56 = vpop.f32.mrf.mxu0  ;;  %v898_v57 = vpop.f32.mrf.mxu1 }
 0x44a   : > { %v879_v62 = vadd.f32 %v878_v56, %v835_v54  ;;  %v899_v63 = vadd.f32 %v898_v57, %v855_v55 }
 0x450   : > { %v923_v58 = vpop.f32.mrf.mxu2  ;;  %v943_v59 = vpop.f32.mrf.mxu3 }
 0x451   : > { %v946_v26 = vadd.f32 %v923_v58, %v879_v62  ;;  %v947_v27 = vadd.f32 %v943_v59, %v899_v63 }
 0x452   : > { %v992_v60 = vpop.f32.mrf.mxu0  ;;  %v1012_v61 = vpop.f32.mrf.mxu1 }
 0x453   : > { %v1015_v7 = vadd.f32 %v992_v60, %v946_v26  ;;  %v1016_v8 = vadd.f32 %v1012_v61, %v947_v27 }
 0x459   : > { %v1039_v3 = vpop.f32.mrf.mxu2  ;;  %v1059_v4 = vpop.f32.mrf.mxu3 }
 0x45a   : > { %v1086_v5 = vpop.f32.mrf.mxu0  ;;  %v1106_v6 = vpop.f32.mrf.mxu1  ;;  %v1062_v9 = vadd.f32 %v1039_v3, %v1015_v7  ;;  %v1063_v10 = vadd.f32 %v1059_v4, %v1016_v8 }
 0x45c   : > { %v1109_v13 = vadd.f32 %v1086_v5, %v1062_v9  ;;  %v1110_v14 = vadd.f32 %v1106_v6, %v1063_v10 }
 0x461   : > { %v1157_v11 = vpop.f32.mrf.mxu2  ;;  %v1177_v12 = vpop.f32.mrf.mxu3 }
 0x462   : > { %v1180_v15 = vadd.f32 %v1157_v11, %v1109_v13  ;;  %v1181_v16 = vadd.f32 %v1177_v12, %v1110_v14  ;;  %v1204_v17 = vpop.f32.mrf.mxu0  ;;  %v1224_v18 = vpop.f32.mrf.mxu1 }
 0x464   : > { %v1227_v19 = vadd.f32 %v1204_v17, %v1180_v15  ;;  %v1228_v20 = vadd.f32 %v1224_v18, %v1181_v16 }
 0x469   : > { %v1251_v22 = vpop.f32.mrf.mxu2  ;;  %v1271_v23 = vpop.f32.mrf.mxu3 }
 0x46a   : > { %v1274_v24 = vadd.f32 %v1251_v22, %v1227_v19  ;;  %v1275_v25 = vadd.f32 %v1271_v23, %v1228_v20 }
 0x46c   : > { %v1276_v28 = vadd.f32 %v1275_v25, %v1274_v24 }
 0x46e   : > { %1277 = vadd.xlane.f32.xlu1 %v1276_v28 }
 0x4e1   : > { %v1278_v29 = vpop.xlane.xlu1 %1277 }
 0x4e2   : > { %v1279_v30 = vmul.f32 %v1278_v29, %v1730_v21 }
 0x4e4   : > { %v1280_v31 = vsub.f32 %v1274_v24, %v1279_v30  ;;  %v1281_v32 = vsub.f32 %v1275_v25, %v1279_v30 }
 0x4e6   : > { %v1282_v33 = vmul.f32 %v1280_v31, %v1280_v31  ;;  %v1283_v1 = vmul.f32 %v1281_v32, %v1281_v32 }
 0x4e8   : > { %v1284_v2 = vadd.f32 %v1283_v1, %v1282_v33 }
 0x4ea   : > { %1285 = vadd.xlane.f32.xlu2 %v1284_v2 }
 0x55d   : > { %v1286_v34 = vpop.xlane.xlu2 %1285 }
 0x55e   : > { %v1287_v35 = vmul.f32 %v1286_v34, %v1730_v21 }
 0x560   : > { %v1288_v36 = vadd.f32 1e-05, %v1287_v35 }
 0x562   : > { %1534 = vrsqrt.f32 %v1288_v36  ;;  %vm1295_vm2 = vweird.f32 %v1288_v36 }
 0x568   : > { %v1535_v37 = vpop.eup %1534 }
 0x569   : > { %v1290_v38 = vmul.f32 %v1535_v37, %v1288_v36  ;;  %vm1296_vm0 = vweird.f32 %v1535_v37 }
 0x56a   : > { %vm1297_vm3 = vmor %vm1295_vm2, %vm1296_vm0 }
 0x56b   : > { %v1291_v39 = vmul.f32 %v1535_v37, %v1290_v38 }
 0x56d   : > { %v1292_v40 = vmul.f32 0.5, %v1291_v39 }
 0x56f   : > { %v1293_v41 = vsub.f32 1.5, %v1292_v40 }
 0x571   : > { %v1294_v42 = vmul.f32 %v1535_v37, %v1293_v41 }
 0x573   : > { %v1298_v43 = vsel %vm1297_vm3, %v1535_v37, %v1294_v42 }
 0x574   : > { %v1300_v44 = vmul.f32 %v1298_v43, %v1281_v32  ;;  %v1299_v45 = vmul.f32 %v1298_v43, %v1280_v31 }
 0x576   : > { %v1303_v46 = vrot.slane %v1300_v44, 4 }
 0x578   : > { %v1304_v21 = vsel %vm1862_vm4, %v1299_v45, %v1303_v46 }
 0x579   : > { %v1306_v47 = vadd.f32 %v1304_v21, %v1586_v0 }
 0x57b   : > { %1307 = vst [vmem:[%s170_s9] sm:$0xff] %v1306_v47 }
 0x57c PF: > { %s13_s12 = sadd.s32 1, %s1542_s12  }
 0x57d   : > { %p10_p4 = scmp.ge.s32.totalorder %s13_s12, 4  }
 0x57f   :  { %12 = sbr.rel (!%p10_p4) target bundleno = 1 (0x1), region = 78 }

</bundles_post_ra>
